<compile_context>
chip_gen: v5e
topology: v5e:2x2
jax: 0.10.0
libtpu: 0.0.40
codegen_flags: <defaults>
</compile_context>

<pallas_src>
import math
import functools

import jax
import jax.numpy as jnp
from jax.experimental import pallas as pl
from jax.experimental.pallas import tpu as pltpu


def make_pos_embedding(emb_size: int, maxlen: int = 5000) -> jnp.ndarray:
    """Replicates PositionalEncoding.__init__ buffer exactly: (maxlen, 1, E) f32."""
    den = jnp.exp(-jnp.arange(0, emb_size, 2, dtype=jnp.float32)
                  * (math.log(10000.0) / emb_size))                  # (E/2,)
    pos = jnp.arange(0, maxlen, dtype=jnp.float32)[:, None]           # (maxlen, 1)
    ang = pos * den                                                    # (maxlen, E/2)
    pe = jnp.stack([jnp.sin(ang), jnp.cos(ang)], axis=-1).reshape(maxlen, emb_size)
    return pe[:, None, :]                                              # (maxlen, 1, E)


# ---------------------------------------------------------------------------
# Kernels
# ---------------------------------------------------------------------------

def _add_pe(x_ref, pe_ref):
    """x + positional table, computed in x's dtype (bf16 stays bf16 on v6e/v7x)."""
    x = x_ref[...]
    pe = pe_ref[...].astype(x.dtype)
    if pe.ndim == x.ndim - 1:            # (T, E) table -> broadcast over batch axis
        pe = pe[:, None, :]
    return x + pe


def _pos_enc_eval_kernel(x_ref, pe_ref, o_ref):
    o_ref[...] = _add_pe(x_ref, pe_ref).astype(o_ref.dtype)


def _pos_enc_dropout_kernel(x_ref, pe_ref, bits_ref, o_ref, *,
                            threshold: int, scale: float):
    y = _add_pe(x_ref, pe_ref)
    # Integer-threshold Bernoulli: keep iff bits >= round(p * 2^32)  (P(keep)=1-p).
    keep = bits_ref[...] >= jnp.uint32(threshold)
    y = jnp.where(keep, y * jnp.asarray(scale, y.dtype), jnp.zeros((), y.dtype))
    o_ref[...] = y.astype(o_ref.dtype)


# ---------------------------------------------------------------------------
# Wrapper
# ---------------------------------------------------------------------------

_TARGET_TILE_BYTES = 2 * 1024 * 1024   # ~2 MiB per input tile: deep pipeline, v7x-safe


def positional_encoding_forward(token_embedding: jnp.ndarray,
                                pos_embedding: jnp.ndarray,
                                *,
                                dropout_p: float = 0.1,
                                training: bool = True,
                                rng=None) -> jnp.ndarray:
    """token_embedding: (S, B, E). pos_embedding: (maxlen, 1, E) (or (maxlen, E))."""
    S, B, E = token_embedding.shape
    maxlen = pos_embedding.shape[0]
    if S > maxlen:
        raise ValueError(f"sequence length {S} exceeds positional table maxlen {maxlen}")

    dtype = token_embedding.dtype
    itemsize = jnp.dtype(dtype).itemsize
    p = float(dropout_p) if training else 0.0
    if p >= 1.0:
        return jnp.zeros_like(token_embedding)
    use_dropout = p > 0.0

    # TODO(synk): dropout mask bits are drawn with jax.random in the wrapper
    # (the TPU in-kernel PRNG has no interpret/CPU lowering); switch to
    # per-tile pltpu.prng_seed(seed + pl.program_id(0)) + prng_random_bits if
    # the extra HBM read of the mask ever becomes the bottleneck.
    if use_dropout:
        if rng is None:
            rng = jax.random.PRNGKey(0)
        threshold = min(int(round(p * (1 << 32))), (1 << 32) - 1)
        scale = 1.0 / (1.0 - p)

    pe_table = pos_embedding.reshape(maxlen, E).astype(jnp.float32)   # squeeze size-1 axis
    compiler_params = pltpu.CompilerParams(dimension_semantics=("parallel",))
    N = S * B * E

    # ---------------- lane-dense flat path (E not a multiple of 128) ------------
    if (E % 128 != 0) and (N % 128 == 0):
        M = N // 128
        x2 = token_embedding.reshape(M, 128)
        pe2 = jnp.broadcast_to(pe_table[:S, None, :], (S, B, E)).reshape(M, 128)

        target_rows = max(8, _TARGET_TILE_BYTES // (128 * itemsize))
        tile_m = M if M <= target_rows else (target_rows // 8) * 8
        grid = (pl.cdiv(M, tile_m),)
        blk = pl.BlockSpec((tile_m, 128), lambda i: (i, 0))

        bytes_accessed = (2 * itemsize + 4 + (4 if use_dropout else 0)) * N
        cost = pl.CostEstimate(flops=N, transcendentals=0, bytes_accessed=bytes_accessed)

        if use_dropout:
            bits = jax.random.bits(rng, (M, 128), dtype=jnp.uint32)
            kernel = functools.partial(_pos_enc_dropout_kernel,
                                       threshold=threshold, scale=scale)
            out2 = pl.pallas_call(
                kernel,
                out_shape=jax.ShapeDtypeStruct((M, 128), dtype),
                grid=grid,
                in_specs=[blk, blk, blk],
                out_specs=blk,
                compiler_params=compiler_params,
                cost_estimate=cost,
            )(x2, pe2, bits)
        else:
            out2 = pl.pallas_call(
                _pos_enc_eval_kernel,
                out_shape=jax.ShapeDtypeStruct((M, 128), dtype),
                grid=grid,
                in_specs=[blk, blk],
                out_specs=blk,
                compiler_params=compiler_params,
                cost_estimate=cost,
            )(x2, pe2)
        return out2.reshape(S, B, E)

    # ---------------- general path: tile over S, table stays (maxlen, E) --------
    row_bytes = max(B * E * itemsize, 1)
    tile_s = max(1, min(S, _TARGET_TILE_BYTES // row_bytes))
    if tile_s >= 8:
        tile_s = (tile_s // 8) * 8          # keep the pe block sublane-aligned
    else:
        tile_s = min(8, maxlen)
    grid = (pl.cdiv(S, tile_s),)

    x_spec = pl.BlockSpec((tile_s, B, E), lambda i: (i, 0, 0))
    pe_spec = pl.BlockSpec((tile_s, E), lambda i: (i, 0))

    bytes_accessed = 2 * N * itemsize + S * E * 4 + (4 * N if use_dropout else 0)
    cost = pl.CostEstimate(flops=N, transcendentals=0, bytes_accessed=bytes_accessed)

    if use_dropout:
        bits = jax.random.bits(rng, (S, B, E), dtype=jnp.uint32)
        kernel = functools.partial(_pos_enc_dropout_kernel,
                                   threshold=threshold, scale=scale)
        return pl.pallas_call(
            kernel,
            out_shape=jax.ShapeDtypeStruct((S, B, E), dtype),
            grid=grid,
            in_specs=[x_spec, pe_spec, x_spec],
            out_specs=x_spec,
            compiler_params=compiler_params,
            cost_estimate=cost,
        )(token_embedding, pe_table, bits)

    return pl.pallas_call(
        _pos_enc_eval_kernel,
        out_shape=jax.ShapeDtypeStruct((S, B, E), dtype),
        grid=grid,
        in_specs=[x_spec, pe_spec],
        out_specs=x_spec,
        compiler_params=compiler_params,
        cost_estimate=cost,
    )(token_embedding, pe_table)


if __name__ == "__main__":
    # Small shapes consistent with the module: seq=8, batch=2, emb_size=32.
    S, B, E = 8, 2, 32
    MAXLEN = 64
    DROPOUT = 0.1

    key = jax.random.PRNGKey(0)
    x_key, drop_key = jax.random.split(key)
    x = jax.random.normal(x_key, (S, B, E), dtype=jnp.float32)

    pos_embedding = make_pos_embedding(E, maxlen=MAXLEN)              # (MAXLEN, 1, E)

    # 1) Eval mode (dropout off): must match the pure-JAX reference exactly.
    out_eval = positional_encoding_forward(
        x, pos_embedding, dropout_p=DROPOUT, training=False)
    out_eval = jax.block_until_ready(out_eval)
    ref = x + pos_embedding[:S]                                       # broadcast over batch
    assert out_eval.shape == (S, B, E)
    assert jnp.allclose(out_eval, ref, atol=1e-6, rtol=1e-6), "eval-mode mismatch"

    # 2) Training mode (dropout on): mask/scale applied inside the kernel.
    out_train = positional_encoding_forward(
        x, pos_embedding, dropout_p=DROPOUT, training=True, rng=drop_key)
    out_train = jax.block_until_ready(out_train)
    assert out_train.shape == (S, B, E)
    assert bool(jnp.all(jnp.isfinite(out_train)))
    keep_frac = float(jnp.mean((out_train != 0).astype(jnp.float32)))
    assert 0.5 < keep_frac <= 1.0, f"unexpected dropout keep fraction {keep_frac}"

    print("KERNEL_OK")
</pallas_src>

<mosaic_0001>
module attributes {stable_mosaic.version = 11 : i64} {
  func.func @_pos_enc_eval_kernel(%arg0: i32, %arg1: memref<4x128xf32, #tpu.memory_space<vmem>>, %arg2: memref<4x128xf32, #tpu.memory_space<vmem>>, %arg3: memref<4x128xf32, #tpu.memory_space<vmem>>) attributes {dimension_semantics = [#tpu.dimension_semantics<parallel>], iteration_bounds = array<i64: 1>, scalar_prefetch = 0 : i64, scratch_operands = 0 : i64, tpu.core_type = #tpu.core_type<tc>, window_params = [{transform_indices = @transform_0, window_bounds = array<i64: 4, 128>}, {transform_indices = @transform_1, window_bounds = array<i64: 4, 128>}, {transform_indices = @transform_2, window_bounds = array<i64: 4, 128>}]} {
    %c0 = arith.constant 0 : index
    %c0_0 = arith.constant 0 : index
    %0 = vector.load %arg1[%c0, %c0_0] : memref<4x128xf32, #tpu.memory_space<vmem>>, vector<4x128xf32>
    %c0_1 = arith.constant 0 : index
    %c0_2 = arith.constant 0 : index
    %1 = vector.load %arg2[%c0_1, %c0_2] : memref<4x128xf32, #tpu.memory_space<vmem>>, vector<4x128xf32>
    %2 = arith.addf %0, %1 : vector<4x128xf32>
    %c0_3 = arith.constant 0 : index
    %c0_4 = arith.constant 0 : index
    %3 = vector.load %arg3[%c0_3, %c0_4] : memref<4x128xf32, #tpu.memory_space<vmem>>, vector<4x128xf32>
    tpu.vector_store %arg3[%c0_3, %c0_4], %2 {strides = array<i32>} : memref<4x128xf32, #tpu.memory_space<vmem>>, vector<4x128xf32>,
    return
  }
  func.func @transform_0(%arg0: i32) -> (i32, i32) {
    %c0_i32 = arith.constant 0 : i32
    %c0_i32_0 = arith.constant 0 : i32
    return %arg0, %c0_i32 : i32, i32
  }
  func.func @transform_1(%arg0: i32) -> (i32, i32) {
    %c0_i32 = arith.constant 0 : i32
    %c0_i32_0 = arith.constant 0 : i32
    return %arg0, %c0_i32 : i32, i32
  }
  func.func @transform_2(%arg0: i32) -> (i32, i32) {
    %c0_i32 = arith.constant 0 : i32
    %c0_i32_0 = arith.constant 0 : i32
    return %arg0, %c0_i32 : i32, i32
  }
}

</mosaic_0001>

<bundles_post_ra>
// kernel: tpu_custom_call.1
= control target key start
LH: loop header
LB: loop body
LE: loop exit
PB: predicated region body
PF: predicated region fallthrough
CT: control target
= control target key end

     0   :  { %7 = vsyncpa [#allocation3], 0  ;;  %s170_s0 = inlined_call_operand.hbm [shape: f32[4,128], index: 0, kind: input, shape index: {}]   ;;  %s171_s1 = inlined_call_operand.hbm [shape: f32[4,128], index: 1, kind: input, shape index: {}]   ;;  %s172_s2 = inlined_call_operand.hbm [shape: f32[4,128], index: 2, kind: output, shape index: {}]  }
   0x1   :  { %8 = vsyncpa [#allocation6], 0 }
   0x2   :  { %9 = vsyncpa [#allocation4], 0  ;;  %s15_s11 = sshll.u32 %s170_s0, 4  ;;  %s143_s12 = smov [#allocation2]   ;;  %s16_s11 = int_to_ptr.hbm [resolvable:$true] %s15_s11 }
   0x3   :  { %s17_s13 = sshll.u32 %s143_s12, 4  ;;  %s26_s16 = sshll.u32 %s171_s1, 4  ;;  %s18_s13 = int_to_ptr.vmem [resolvable:$true] %s17_s13  ;;  %s27_s16 = int_to_ptr.hbm [resolvable:$true] %s26_s16 }
   0x4   :  { %20 = dma.hbm_to_vmem [thread:$0]  %s16_s11, 64, %s18_s13, [#allocation3]  }
   0x5   :  { %s144_s17 = smov [#allocation5]  }
   0x6   :  { %s28_s18 = sshll.u32 %s144_s17, 4  ;;  %s29_s18 = int_to_ptr.vmem [resolvable:$true] %s28_s18 }
   0x7   :  { %31 = dma.hbm_to_vmem [thread:$0]  %s27_s16, 64, %s29_s18, [#allocation6]  }
   0x8   :  { %137 = dma.done.wait [#allocation3], 64  }
   0x9   :  { %138 = vsyncadd [#allocation3], 4294967232 }
   0xa   :  { %139 = dma.done.wait [#allocation6], 64  }
   0xb   :  { %140 = vsyncadd [#allocation6], 4294967232  ;;  %s145_s19 = smov [#allocation7]   ;;  %s51_s22 = sshll.u32 %s172_s2, 4  ;;  %v40_v0 = vld [vmem:[#allocation2] sm:$0xf]  ;;  %s52_s22 = int_to_ptr.hbm [resolvable:$true] %s51_s22 }
   0xc   :  { %s49_s0 = sshll.u32 %s145_s19, 4  ;;  %v41_v1 = vld [vmem:[#allocation5] sm:$0xf]  ;;  %s50_s0 = int_to_ptr.vmem [resolvable:$true] %s49_s0 }
   0xd   :  { %v42_v2 = vadd.f32 %v41_v1, %v40_v0 }
   0xf   :  { %43 = vst [vmem:[#allocation7] sm:$0xf] %v42_v2 }
  0x10   :  { %54 = dma.vmem_to_hbm [thread:$0]  %s50_s0, 64, %s52_s22, [#allocation4]  }
  0x11   :  { %141 = dma.done.wait [#allocation4], 64  }
  0x12   :  { %142 = vsyncadd [#allocation4], 4294967232 }
  0x13   :  { %59 = vsyncpa [#allocation3], 1 }
  0x14   :  { %60 = vsyncpa [#allocation6], 1 }
  0x15   :  { %61 = vsyncpa [#allocation4], 1 }

</bundles_post_ra>
